<compile_context>
chip_gen: v5e
topology: v5e:2x2
jax: 0.10.0
libtpu: 0.0.40
codegen_flags: <defaults>
</compile_context>

<pallas_src>
import functools

import numpy as np
import jax
import jax.numpy as jnp
from jax.experimental import pallas as pl
from jax.experimental.pallas import tpu as pltpu

START = 0.0
STOP = 2.0
NUM_GAUSSIANS = 50


def _round_up(x, m):
    return ((x + m - 1) // m) * m


def _rbf_constants(start, stop, num_gaussians):
    if num_gaussians < 2:
        raise ValueError("num_gaussians must be >= 2")
    offset = np.linspace(start, stop, num_gaussians, dtype=np.float32)
    coeff = -0.5 / float(offset[1] - offset[0]) ** 2
    return offset, coeff


def _rbf_kernel(offset_ref, dist_ref, out_ref, *, stop, coeff):
    # offset_ref: (1, G) f32   exact linspace offsets, resident in VMEM
    # dist_ref:   (R, 1) f32   one distance per output row (rows on sublanes)
    # out_ref:    (R, G) out   G == full last dim -> contiguous HBM writeback
    d = jnp.minimum(dist_ref[...], stop)             # clamp_max, per-row (R, 1)
    diff = d - offset_ref[...]                       # (R,1) - (1,G) -> (R,G)
    out_ref[...] = jnp.exp(coeff * diff * diff).astype(out_ref.dtype)  # exp on EUP


def dist_rbf(dist, *, start=START, stop=STOP, num_gaussians=NUM_GAUSSIANS,
             tile_rows=4096, out_dtype=jnp.float32):
    """dist: (...,) float -> (..., num_gaussians), matching DistRBF.forward.

    tile_rows: distances (output rows) per grid step; multiple of 8. At 4096 each
    step writes ~0.8 MiB (f32), keeping per-step overhead <~15-20% of the HBM
    time while the double-buffered VMEM footprint stays well inside 32 MiB.
    out_dtype=jnp.bfloat16 halves the dominant output writeback (math stays f32).
    """
    offset_np, coeff = _rbf_constants(start, stop, num_gaussians)
    offsets = jnp.asarray(offset_np).reshape(1, num_gaussians)

    orig_shape = dist.shape
    flat = dist.reshape(-1).astype(jnp.float32)
    n = flat.shape[0]

    # Shrink the tile for small inputs so we don't compute a huge padded tail.
    tr = min(_round_up(tile_rows, 8), _round_up(max(n, 1), 8))
    num_chunks = pl.cdiv(max(n, 1), tr)
    padded_n = num_chunks * tr
    if padded_n != n:
        # TODO(synk): a remainder-sized last block (pl.BoundedSlice / masked tail)
        # would avoid this small extra input copy; input is ~2% of total traffic.
        flat = jnp.pad(flat, (0, padded_n - n))
    dist2d = flat.reshape(padded_n, 1)

    kernel = functools.partial(_rbf_kernel, stop=float(stop), coeff=float(coeff))

    out = pl.pallas_call(
        kernel,
        out_shape=jax.ShapeDtypeStruct((padded_n, num_gaussians), out_dtype),
        grid_spec=pltpu.PrefetchScalarGridSpec(
            num_scalar_prefetch=0,
            grid=(num_chunks,),
            in_specs=[
                pl.BlockSpec((1, num_gaussians), lambda i: (0, 0)),   # offsets: resident
                pl.BlockSpec((tr, 1), lambda i: (i, 0)),              # distances
            ],
            out_specs=pl.BlockSpec((tr, num_gaussians), lambda i: (i, 0)),
        ),
        compiler_params=pltpu.CompilerParams(
            dimension_semantics=("parallel",),   # v7x: shard chunks across both TCs
            vmem_limit_bytes=32 * 1024 * 1024,
        ),
    )(offsets, dist2d)

    out = out[:n]
    return out.reshape(*orig_shape, num_gaussians)


def dist_rbf_ref(dist, *, start=START, stop=STOP, num_gaussians=NUM_GAUSSIANS):
    offset_np, coeff = _rbf_constants(start, stop, num_gaussians)
    offset = jnp.asarray(offset_np)
    d = jnp.minimum(dist.astype(jnp.float32), stop)
    diff = d[..., None] - offset
    return jnp.exp(coeff * diff * diff)


if __name__ == "__main__":
    key = jax.random.PRNGKey(0)
    k1, k2 = jax.random.split(key)

    # small synthetic edge counts; deliberately NOT multiples of the tile or of 8;
    # distances in [0, 3] so clamping at stop=2.0 is exercised.
    dist1 = jax.random.uniform(k1, (200,), dtype=jnp.float32, minval=0.0, maxval=3.0)
    dist2 = jax.random.uniform(k2, (8, 37), dtype=jnp.float32, minval=0.0, maxval=3.0)

    out1 = jax.block_until_ready(dist_rbf(dist1))
    out2 = jax.block_until_ready(dist_rbf(dist2))

    ref1 = dist_rbf_ref(dist1)
    ref2 = dist_rbf_ref(dist2)

    assert out1.shape == (200, NUM_GAUSSIANS)
    assert out2.shape == (8, 37, NUM_GAUSSIANS)
    # Offsets are now the exact linspace values, so only exp rounding differs.
    assert jnp.allclose(out1, ref1, atol=1e-5, rtol=1e-5), "mismatch vs reference (1D)"
    assert jnp.allclose(out2, ref2, atol=1e-5, rtol=1e-5), "mismatch vs reference (2D)"

    # Optional bf16 output path (math stays f32, cast only at the store).
    out_bf16 = jax.block_until_ready(dist_rbf(dist1, out_dtype=jnp.bfloat16))
    assert out_bf16.dtype == jnp.bfloat16
    assert jnp.allclose(out_bf16.astype(jnp.float32), ref1, atol=2e-2, rtol=2e-2)

    print("KERNEL_OK")
</pallas_src>

<mosaic_0001>
module attributes {stable_mosaic.version = 11 : i64} {
  func.func @_rbf_kernel(%arg0: i32, %arg1: memref<1x50xf32, #tpu.memory_space<vmem>>, %arg2: memref<200x1xf32, #tpu.memory_space<vmem>>, %arg3: memref<200x50xf32, #tpu.memory_space<vmem>>) attributes {dimension_semantics = [#tpu.dimension_semantics<parallel>], iteration_bounds = array<i64: 1>, scalar_prefetch = 0 : i64, scratch_operands = 0 : i64, tpu.core_type = #tpu.core_type<tc>, window_params = [{pipeline_mode = #tpu.pipeline_mode<synchronous>, transform_indices = @transform_0, window_bounds = array<i64: 1, 50>}, {transform_indices = @transform_1, window_bounds = array<i64: 200, 1>}, {transform_indices = @transform_2, window_bounds = array<i64: 200, 50>}]} {
    %c0 = arith.constant 0 : index
    %c0_0 = arith.constant 0 : index
    %0 = vector.load %arg2[%c0, %c0_0] : memref<200x1xf32, #tpu.memory_space<vmem>>, vector<200x1xf32>
    %cst = arith.constant 2.000000e+00 : f32
    %1 = vector.broadcast %cst : f32 to vector<200x1xf32>
    %2 = arith.minimumf %0, %1 : vector<200x1xf32>
    %c0_1 = arith.constant 0 : index
    %c0_2 = arith.constant 0 : index
    %3 = vector.load %arg1[%c0_1, %c0_2] : memref<1x50xf32, #tpu.memory_space<vmem>>, vector<1x50xf32>
    %4 = vector.broadcast %2 : vector<200x1xf32> to vector<200x50xf32>
    %5 = vector.broadcast %3 : vector<1x50xf32> to vector<200x50xf32>
    %6 = arith.subf %4, %5 : vector<200x50xf32>
    %cst_3 = arith.constant -3.001250e+02 : f32
    %7 = vector.broadcast %cst_3 : f32 to vector<200x50xf32>
    %8 = arith.mulf %7, %6 : vector<200x50xf32>
    %9 = arith.mulf %8, %6 : vector<200x50xf32>
    %10 = math.exp %9 : vector<200x50xf32>
    %c0_4 = arith.constant 0 : index
    %c0_5 = arith.constant 0 : index
    %11 = vector.load %arg3[%c0_4, %c0_5] : memref<200x50xf32, #tpu.memory_space<vmem>>, vector<200x50xf32>
    tpu.vector_store %arg3[%c0_4, %c0_5], %10 {strides = array<i32>} : memref<200x50xf32, #tpu.memory_space<vmem>>, vector<200x50xf32>,
    return
  }
  func.func @transform_0(%arg0: i32) -> (i32, i32) {
    %c0_i32 = arith.constant 0 : i32
    %c0_i32_0 = arith.constant 0 : i32
    %c0_i32_1 = arith.constant 0 : i32
    return %c0_i32, %c0_i32_0 : i32, i32
  }
  func.func @transform_1(%arg0: i32) -> (i32, i32) {
    %c0_i32 = arith.constant 0 : i32
    %c0_i32_0 = arith.constant 0 : i32
    return %arg0, %c0_i32 : i32, i32
  }
  func.func @transform_2(%arg0: i32) -> (i32, i32) {
    %c0_i32 = arith.constant 0 : i32
    %c0_i32_0 = arith.constant 0 : i32
    return %arg0, %c0_i32 : i32, i32
  }
}

</mosaic_0001>

<bundles_post_ra>
// kernel: tpu_custom_call.1
= control target key start
LH: loop header
LB: loop body
LE: loop exit
PB: predicated region body
PF: predicated region fallthrough
CT: control target
= control target key end

     0   :  { %v400_v0 = vmov 0   ;;  %vm315_vm0 = vcmask 408576   ;;  %s621_s1 = inlined_call_operand.vmem [shape: f32[200,1], index: 1, kind: input, shape index: {}]   ;;  %s622_s0 = inlined_call_operand.vmem [shape: f32[1,50], index: 0, kind: input, shape index: {}]   ;;  %s623_s2 = inlined_call_operand.vmem [shape: f32[200,50], index: 2, kind: output, shape index: {}]  }
   0x1   :  { %348 = vset.pattern.permute.xlu2 %v400_v0  ;;  %347 = vset.pattern.permute.xlu1 %v400_v0  ;;  %v15_v1 = vld [vmem:[%s621_s1 + $0x20] sm:$0xff]  ;;  %v13_v2 = vld [vmem:[%s621_s1 + $0x10] sm:$0xff]  ;;  %v16_v7 = vld [vmem:[%s621_s1 + $0x28] sm:$0xff] }
   0x2   :  { %v11_v3 = vld [vmem:[%s621_s1] sm:$0xff]  ;;  %346 = vset.pattern.permute.xlu0 %v400_v0  ;;  %v40_v4 = vmin.f32 %v15_v1, 2.0  ;;  %v38_v5 = vmin.f32 %v13_v2, 2.0  ;;  %v14_v8 = vld [vmem:[%s621_s1 + $0x18] sm:$0xff]  ;;  %v12_v9 = vld [vmem:[%s621_s1 + $0x8] sm:$0xff]  ;;  %v41_v10 = vmin.f32 %v16_v7, 2.0 }
   0x3   :  { %v36_v6 = vmin.f32 %v11_v3, 2.0  ;;  %v39_v11 = vmin.f32 %v14_v8, 2.0  ;;  %v37_v12 = vmin.f32 %v12_v9, 2.0  ;;  %v19_v13 = vld [vmem:[%s621_s1 + $0x40] sm:$0xff]  ;;  %v18_v14 = vld [vmem:[%s621_s1 + $0x38] sm:$0xff]  ;;  %v17_v15 = vld [vmem:[%s621_s1 + $0x30] sm:$0xff] }
   0x4   :  { %84 = vperm.xlu2 %348, %v40_v4   ;;  %74 = vperm.xlu1 %347, %v38_v5   ;;  %v44_v16 = vmin.f32 %v19_v13, 2.0  ;;  %v43_v17 = vmin.f32 %v18_v14, 2.0  ;;  %v42_v18 = vmin.f32 %v17_v15, 2.0  ;;  %v22_v19 = vld [vmem:[%s621_s1 + $0x58] sm:$0xff]  ;;  %v21_v20 = vld [vmem:[%s621_s1 + $0x50] sm:$0xff]  ;;  %v20_v21 = vld [vmem:[%s621_s1 + $0x48] sm:$0xff] }
   0x5   :  { %64 = vperm.xlu0 %346, %v36_v6   ;;  %v47_v22 = vmin.f32 %v22_v19, 2.0  ;;  %v46_v23 = vmin.f32 %v21_v20, 2.0  ;;  %v45_v24 = vmin.f32 %v20_v21, 2.0  ;;  %v25_v25 = vld [vmem:[%s621_s1 + $0x70] sm:$0xff]  ;;  %v24_v26 = vld [vmem:[%s621_s1 + $0x68] sm:$0xff]  ;;  %v23_v27 = vld [vmem:[%s621_s1 + $0x60] sm:$0xff] }
   0x6   :  { %v50_v28 = vmin.f32 %v25_v25, 2.0  ;;  %v49_v29 = vmin.f32 %v24_v26, 2.0  ;;  %v48_v30 = vmin.f32 %v23_v27, 2.0  ;;  %v28_v31 = vld [vmem:[%s621_s1 + $0x88] sm:$0xff]  ;;  %v27_v32 = vld [vmem:[%s621_s1 + $0x80] sm:$0xff]  ;;  %v26_v33 = vld [vmem:[%s621_s1 + $0x78] sm:$0xff] }
   0x7   :  { %v53_v34 = vmin.f32 %v28_v31, 2.0  ;;  %v52_v35 = vmin.f32 %v27_v32, 2.0  ;;  %v51_v36 = vmin.f32 %v26_v33, 2.0  ;;  %v31_v37 = vld [vmem:[%s621_s1 + $0xa0] sm:$0xff]  ;;  %v30_v38 = vld [vmem:[%s621_s1 + $0x98] sm:$0xff]  ;;  %v29_v39 = vld [vmem:[%s621_s1 + $0x90] sm:$0xff] }
   0x8   :  { %v56_v40 = vmin.f32 %v31_v37, 2.0  ;;  %v55_v41 = vmin.f32 %v30_v38, 2.0  ;;  %v54_v42 = vmin.f32 %v29_v39, 2.0  ;;  %v34_v43 = vld [vmem:[%s621_s1 + $0xb8] sm:$0xff]  ;;  %v33_v44 = vld [vmem:[%s621_s1 + $0xb0] sm:$0xff]  ;;  %v32_v45 = vld [vmem:[%s621_s1 + $0xa8] sm:$0xff] }
   0x9   :  { %v59_v46 = vmin.f32 %v34_v43, 2.0  ;;  %v58_v47 = vmin.f32 %v33_v44, 2.0  ;;  %v57_v48 = vmin.f32 %v32_v45, 2.0  ;;  %v35_v49 = vld [vmem:[%s621_s1 + $0xc0] sm:$0xff] }
   0xa   :  { %v60_v50 = vmin.f32 %v35_v49, 2.0  ;;  %v494_v51 = vld [vmem:[%s622_s0] ss:$0 sm:$0xff] }
   0xc   :  { %89 = vperm.xlu2 %348, %v41_v10   ;;  %79 = vperm.xlu1 %347, %v39_v11  }
   0xd   :  { %69 = vperm.xlu0 %346, %v37_v12  }
  0x14   :  { %104 = vperm.xlu2 %348, %v44_v16   ;;  %99 = vperm.xlu1 %347, %v43_v17  }
  0x15   :  { %94 = vperm.xlu0 %346, %v42_v18  }
  0x1c   :  { %119 = vperm.xlu2 %348, %v47_v22   ;;  %114 = vperm.xlu1 %347, %v46_v23  }
  0x1d   :  { %109 = vperm.xlu0 %346, %v45_v24  }
  0x24   :  { %134 = vperm.xlu2 %348, %v50_v28   ;;  %129 = vperm.xlu1 %347, %v49_v29  }
  0x25   :  { %124 = vperm.xlu0 %346, %v48_v30  }
  0x2c   :  { %149 = vperm.xlu2 %348, %v53_v34   ;;  %144 = vperm.xlu1 %347, %v52_v35  }
  0x2d   :  { %139 = vperm.xlu0 %346, %v51_v36  }
  0x34   :  { %164 = vperm.xlu2 %348, %v56_v40   ;;  %159 = vperm.xlu1 %347, %v55_v41  }
  0x35   :  { %154 = vperm.xlu0 %346, %v54_v42  }
  0x3c   :  { %179 = vperm.xlu2 %348, %v59_v46   ;;  %174 = vperm.xlu1 %347, %v58_v47  }
  0x3d   :  { %169 = vperm.xlu0 %346, %v57_v48  }
  0x45   :  { %184 = vperm.xlu0 %346, %v60_v50  }
  0x5e   :  { %v85_v52 = vpop.permute.xlu2 %84 }
  0x5f   :  { %v194_v53 = vsub.f32 %v85_v52, %v494_v51 }
  0x61   :  { %v219_v54 = vmul.f32 -300.125, %v194_v53 }
  0x63   :  { %v244_v55 = vmul.f32 %v219_v54, %v194_v53 }
  0x65   :  { %v273_v56 = vmul.f32 1.442695, %v244_v55 }
  0x66   :  { %v90_v57 = vpop.permute.xlu2 %89 }
  0x67   :  { %350 = vpow2.f32 %v273_v56  ;;  %v195_v58 = vsub.f32 %v90_v57, %v494_v51 }
  0x69   :  { %v220_v59 = vmul.f32 -300.125, %v195_v58 }
  0x6b   :  { %v245_v60 = vmul.f32 %v220_v59, %v195_v58 }
  0x6d   :  { %v351_v61 = vpop.eup %350  ;;  %v275_v62 = vmul.f32 1.442695, %v245_v60 }
  0x6e   :  { %320 = vst.msk [vmem:[%s623_s2 + $0x20] sm:$0xff] %vm315_vm0, %v351_v61  ;;  %v105_v63 = vpop.permute.xlu2 %104 }
  0x6f   :  { %352 = vpow2.f32 %v275_v62  ;;  %v198_v0 = vsub.f32 %v105_v63, %v494_v51 }
  0x71   :  { %v223_v1 = vmul.f32 -300.125, %v198_v0 }
  0x73   :  { %v248_v2 = vmul.f32 %v223_v1, %v198_v0 }
  0x75   :  { %v353_v3 = vpop.eup %352  ;;  %v281_v4 = vmul.f32 1.442695, %v248_v2 }
  0x76   :  { %321 = vst.msk [vmem:[%s623_s2 + $0x28] sm:$0xff] %vm315_vm0, %v353_v3  ;;  %v120_v5 = vpop.permute.xlu2 %119  ;;  %v75_v6 = vpop.permute.xlu1 %74 }
  0x77   :  { %354 = vpow2.f32 %v281_v4  ;;  %v201_v7 = vsub.f32 %v120_v5, %v494_v51  ;;  %v192_v8 = vsub.f32 %v75_v6, %v494_v51  ;;  %v65_v9 = vpop.permute.xlu0 %64 }
  0x78   :  { %v190_v10 = vsub.f32 %v65_v9, %v494_v51 }
  0x79   :  { %v226_v11 = vmul.f32 -300.125, %v201_v7  ;;  %v217_v12 = vmul.f32 -300.125, %v192_v8 }
  0x7a   :  { %v215_v13 = vmul.f32 -300.125, %v190_v10 }
  0x7b   :  { %v251_v14 = vmul.f32 %v226_v11, %v201_v7  ;;  %v242_v15 = vmul.f32 %v217_v12, %v192_v8 }
  0x7c   :  { %v240_v16 = vmul.f32 %v215_v13, %v190_v10 }
  0x7d   :  { %v355_v17 = vpop.eup %354  ;;  %v287_v18 = vmul.f32 1.442695, %v251_v14  ;;  %v269_v19 = vmul.f32 1.442695, %v242_v15 }
  0x7e   :  { %324 = vst.msk [vmem:[%s623_s2 + $0x40] sm:$0xff] %vm315_vm0, %v355_v17  ;;  %v265_v20 = vmul.f32 1.442695, %v240_v16  ;;  %v135_v21 = vpop.permute.xlu2 %134  ;;  %v80_v22 = vpop.permute.xlu1 %79 }
  0x7f   :  { %356 = vpow2.f32 %v287_v18  ;;  %v204_v23 = vsub.f32 %v135_v21, %v494_v51  ;;  %v193_v24 = vsub.f32 %v80_v22, %v494_v51  ;;  %v70_v25 = vpop.permute.xlu0 %69 }
  0x80   :  { %358 = vpow2.f32 %v269_v19  ;;  %v191_v26 = vsub.f32 %v70_v25, %v494_v51 }
  0x81   :  { %360 = vpow2.f32 %v265_v20  ;;  %v229_v27 = vmul.f32 -300.125, %v204_v23  ;;  %v218_v28 = vmul.f32 -300.125, %v193_v24 }
  0x82   :  { %v216_v29 = vmul.f32 -300.125, %v191_v26 }
  0x83   :  { %v254_v30 = vmul.f32 %v229_v27, %v204_v23  ;;  %v243_v31 = vmul.f32 %v218_v28, %v193_v24 }
  0x84   :  { %v241_v32 = vmul.f32 %v216_v29, %v191_v26 }
  0x85   :  { %v357_v33 = vpop.eup %356  ;;  %v293_v34 = vmul.f32 1.442695, %v254_v30  ;;  %v271_v35 = vmul.f32 1.442695, %v243_v31 }
  0x86   :  { %v359_v36 = vpop.eup %358  ;;  %327 = vst.msk [vmem:[%s623_s2 + $0x58] sm:$0xff] %vm315_vm0, %v357_v33  ;;  %v267_v37 = vmul.f32 1.442695, %v241_v32  ;;  %v150_v38 = vpop.permute.xlu2 %149 }
  0x87   :  { %v100_v39 = vpop.permute.xlu1 %99  ;;  %v361_v40 = vpop.eup %360  ;;  %318 = vst.msk [vmem:[%s623_s2 + $0x10] sm:$0xff] %vm315_vm0, %v359_v36  ;;  %362 = vpow2.f32 %v293_v34  ;;  %v207_v41 = vsub.f32 %v150_v38, %v494_v51 }
  0x88   :  { %v197_v42 = vsub.f32 %v100_v39, %v494_v51  ;;  %v95_v43 = vpop.permute.xlu0 %94  ;;  %316 = vst.msk [vmem:[%s623_s2] sm:$0xff] %vm315_vm0, %v361_v40  ;;  %364 = vpow2.f32 %v271_v35 }
  0x89   :  { %v196_v44 = vsub.f32 %v95_v43, %v494_v51  ;;  %366 = vpow2.f32 %v267_v37  ;;  %v232_v45 = vmul.f32 -300.125, %v207_v41 }
  0x8a   :  { %v222_v46 = vmul.f32 -300.125, %v197_v42 }
  0x8b   :  { %v221_v47 = vmul.f32 -300.125, %v196_v44  ;;  %v257_v48 = vmul.f32 %v232_v45, %v207_v41 }
  0x8c   :  { %v247_v49 = vmul.f32 %v222_v46, %v197_v42 }
  0x8d   :  { %v246_v50 = vmul.f32 %v221_v47, %v196_v44  ;;  %v363_v52 = vpop.eup %362  ;;  %v299_v53 = vmul.f32 1.442695, %v257_v48 }
  0x8e   :  { %v279_v54 = vmul.f32 1.442695, %v247_v49  ;;  %v365_v55 = vpop.eup %364  ;;  %330 = vst.msk [vmem:[%s623_s2 + $0x70] sm:$0xff] %vm315_vm0, %v363_v52  ;;  %v165_v57 = vpop.permute.xlu2 %164 }
  0x8f   :  { %v277_v56 = vmul.f32 1.442695, %v246_v50  ;;  %v115_v58 = vpop.permute.xlu1 %114  ;;  %v367_v59 = vpop.eup %366  ;;  %319 = vst.msk [vmem:[%s623_s2 + $0x18] sm:$0xff] %vm315_vm0, %v365_v55  ;;  %368 = vpow2.f32 %v299_v53  ;;  %v210_v60 = vsub.f32 %v165_v57, %v494_v51 }
  0x90   :  { %v200_v61 = vsub.f32 %v115_v58, %v494_v51  ;;  %v110_v62 = vpop.permute.xlu0 %109  ;;  %317 = vst.msk [vmem:[%s623_s2 + $0x8] sm:$0xff] %vm315_vm0, %v367_v59  ;;  %370 = vpow2.f32 %v279_v54 }
  0x91   :  { %v199_v63 = vsub.f32 %v110_v62, %v494_v51  ;;  %372 = vpow2.f32 %v277_v56  ;;  %v235_v0 = vmul.f32 -300.125, %v210_v60 }
  0x92   :  { %v225_v1 = vmul.f32 -300.125, %v200_v61 }
  0x93   :  { %v224_v2 = vmul.f32 -300.125, %v199_v63  ;;  %v260_v3 = vmul.f32 %v235_v0, %v210_v60 }
  0x94   :  { %v250_v4 = vmul.f32 %v225_v1, %v200_v61 }
  0x95   :  { %v249_v5 = vmul.f32 %v224_v2, %v199_v63  ;;  %v369_v6 = vpop.eup %368  ;;  %v305_v7 = vmul.f32 1.442695, %v260_v3 }
  0x96   :  { %v285_v8 = vmul.f32 1.442695, %v250_v4  ;;  %v371_v9 = vpop.eup %370  ;;  %333 = vst.msk [vmem:[%s623_s2 + $0x88] sm:$0xff] %vm315_vm0, %v369_v6  ;;  %v180_v11 = vpop.permute.xlu2 %179 }
  0x97   :  { %v283_v10 = vmul.f32 1.442695, %v249_v5  ;;  %v130_v12 = vpop.permute.xlu1 %129  ;;  %v373_v13 = vpop.eup %372  ;;  %323 = vst.msk [vmem:[%s623_s2 + $0x38] sm:$0xff] %vm315_vm0, %v371_v9  ;;  %374 = vpow2.f32 %v305_v7  ;;  %v213_v14 = vsub.f32 %v180_v11, %v494_v51 }
  0x98   :  { %v203_v15 = vsub.f32 %v130_v12, %v494_v51  ;;  %v125_v16 = vpop.permute.xlu0 %124  ;;  %322 = vst.msk [vmem:[%s623_s2 + $0x30] sm:$0xff] %vm315_vm0, %v373_v13  ;;  %376 = vpow2.f32 %v285_v8 }
  0x99   :  { %v202_v17 = vsub.f32 %v125_v16, %v494_v51  ;;  %378 = vpow2.f32 %v283_v10  ;;  %v238_v18 = vmul.f32 -300.125, %v213_v14 }
  0x9a   :  { %v228_v19 = vmul.f32 -300.125, %v203_v15 }
  0x9b   :  { %v227_v20 = vmul.f32 -300.125, %v202_v17  ;;  %v263_v21 = vmul.f32 %v238_v18, %v213_v14 }
  0x9c   :  { %v253_v22 = vmul.f32 %v228_v19, %v203_v15 }
  0x9d   :  { %v252_v23 = vmul.f32 %v227_v20, %v202_v17  ;;  %v375_v24 = vpop.eup %374  ;;  %v311_v25 = vmul.f32 1.442695, %v263_v21 }
  0x9e   :  { %v291_v26 = vmul.f32 1.442695, %v253_v22  ;;  %v377_v27 = vpop.eup %376  ;;  %336 = vst.msk [vmem:[%s623_s2 + $0xa0] sm:$0xff] %vm315_vm0, %v375_v24 }
  0x9f   :  { %v289_v28 = vmul.f32 1.442695, %v252_v23  ;;  %v145_v29 = vpop.permute.xlu1 %144  ;;  %v379_v30 = vpop.eup %378  ;;  %326 = vst.msk [vmem:[%s623_s2 + $0x50] sm:$0xff] %vm315_vm0, %v377_v27  ;;  %380 = vpow2.f32 %v311_v25 }
  0xa0   :  { %v206_v31 = vsub.f32 %v145_v29, %v494_v51  ;;  %v140_v32 = vpop.permute.xlu0 %139  ;;  %325 = vst.msk [vmem:[%s623_s2 + $0x48] sm:$0xff] %vm315_vm0, %v379_v30  ;;  %382 = vpow2.f32 %v291_v26 }
  0xa1   :  { %v205_v33 = vsub.f32 %v140_v32, %v494_v51  ;;  %384 = vpow2.f32 %v289_v28 }
  0xa2   :  { %v231_v34 = vmul.f32 -300.125, %v206_v31 }
  0xa3   :  { %v230_v35 = vmul.f32 -300.125, %v205_v33 }
  0xa4   :  { %v256_v36 = vmul.f32 %v231_v34, %v206_v31 }
  0xa5   :  { %v255_v37 = vmul.f32 %v230_v35, %v205_v33  ;;  %v381_v38 = vpop.eup %380 }
  0xa6   :  { %v297_v39 = vmul.f32 1.442695, %v256_v36  ;;  %v383_v40 = vpop.eup %382  ;;  %339 = vst.msk [vmem:[%s623_s2 + $0xb8] sm:$0xff] %vm315_vm0, %v381_v38 }
  0xa7   :  { %v295_v41 = vmul.f32 1.442695, %v255_v37  ;;  %v160_v42 = vpop.permute.xlu1 %159  ;;  %v385_v43 = vpop.eup %384  ;;  %329 = vst.msk [vmem:[%s623_s2 + $0x68] sm:$0xff] %vm315_vm0, %v383_v40 }
  0xa8   :  { %386 = vpow2.f32 %v297_v39  ;;  %v209_v44 = vsub.f32 %v160_v42, %v494_v51  ;;  %v155_v45 = vpop.permute.xlu0 %154  ;;  %328 = vst.msk [vmem:[%s623_s2 + $0x60] sm:$0xff] %vm315_vm0, %v385_v43 }
  0xa9   :  { %388 = vpow2.f32 %v295_v41  ;;  %v208_v46 = vsub.f32 %v155_v45, %v494_v51 }
  0xaa   :  { %v234_v47 = vmul.f32 -300.125, %v209_v44 }
  0xab   :  { %v233_v48 = vmul.f32 -300.125, %v208_v46 }
  0xac   :  { %v259_v49 = vmul.f32 %v234_v47, %v209_v44 }
  0xad   :  { %v258_v50 = vmul.f32 %v233_v48, %v208_v46 }
  0xae   :  { %v387_v52 = vpop.eup %386  ;;  %v303_v53 = vmul.f32 1.442695, %v259_v49 }
  0xaf   :  { %v389_v54 = vpop.eup %388  ;;  %332 = vst.msk [vmem:[%s623_s2 + $0x80] sm:$0xff] %vm315_vm0, %v387_v52  ;;  %v301_v55 = vmul.f32 1.442695, %v258_v50  ;;  %v175_v56 = vpop.permute.xlu1 %174 }
  0xb0   :  { %331 = vst.msk [vmem:[%s623_s2 + $0x78] sm:$0xff] %vm315_vm0, %v389_v54  ;;  %390 = vpow2.f32 %v303_v53  ;;  %v212_v57 = vsub.f32 %v175_v56, %v494_v51  ;;  %v170_v58 = vpop.permute.xlu0 %169 }
  0xb1   :  { %392 = vpow2.f32 %v301_v55  ;;  %v211_v59 = vsub.f32 %v170_v58, %v494_v51 }
  0xb2   :  { %v237_v60 = vmul.f32 -300.125, %v212_v57 }
  0xb3   :  { %v236_v61 = vmul.f32 -300.125, %v211_v59 }
  0xb4   :  { %v262_v62 = vmul.f32 %v237_v60, %v212_v57 }
  0xb5   :  { %v261_v63 = vmul.f32 %v236_v61, %v211_v59 }
  0xb6   :  { %v391_v0 = vpop.eup %390  ;;  %v309_v1 = vmul.f32 1.442695, %v262_v62 }
  0xb7   :  { %v393_v2 = vpop.eup %392  ;;  %335 = vst.msk [vmem:[%s623_s2 + $0x98] sm:$0xff] %vm315_vm0, %v391_v0  ;;  %v307_v3 = vmul.f32 1.442695, %v261_v63 }
  0xb8   :  { %334 = vst.msk [vmem:[%s623_s2 + $0x90] sm:$0xff] %vm315_vm0, %v393_v2  ;;  %394 = vpow2.f32 %v309_v1  ;;  %v185_v4 = vpop.permute.xlu0 %184 }
  0xb9   :  { %396 = vpow2.f32 %v307_v3  ;;  %v214_v5 = vsub.f32 %v185_v4, %v494_v51 }
  0xbb   :  { %v239_v6 = vmul.f32 -300.125, %v214_v5 }
  0xbd   :  { %v264_v7 = vmul.f32 %v239_v6, %v214_v5 }
  0xbe   :  { %v395_v8 = vpop.eup %394 }
  0xbf   :  { %v397_v9 = vpop.eup %396  ;;  %338 = vst.msk [vmem:[%s623_s2 + $0xb0] sm:$0xff] %vm315_vm0, %v395_v8  ;;  %v313_v10 = vmul.f32 1.442695, %v264_v7 }
  0xc0   :  { %337 = vst.msk [vmem:[%s623_s2 + $0xa8] sm:$0xff] %vm315_vm0, %v397_v9 }
  0xc1   :  { %398 = vpow2.f32 %v313_v10 }
  0xc7   :  { %v399_v11 = vpop.eup %398 }
  0xc8   :  { %340 = vst.msk [vmem:[%s623_s2 + $0xc0] sm:$0xff] %vm315_vm0, %v399_v11 }

</bundles_post_ra>
